<compile_context>
chip_gen: v5e
topology: v5e:2x2
jax: 0.10.0
libtpu: 0.0.40
codegen_flags: <defaults>
</compile_context>

<pallas_src>
import jax
import jax.numpy as jnp
from jax.experimental import pallas as pl
from jax.experimental.pallas import tpu as pltpu

_LANE = 128
_TARGET_BLOCK_BYTES = 4 * 1024 * 1024   # ~4 MiB blocks on the big-tensor path
_MIN_PIPELINE_STEPS = 4                 # keep >= 4 grid steps (pipelining + megacore)
_VMEM_LIMIT_BYTES = 40 * 1024 * 1024    # 2 arrays x 2 bufs x 4 MiB = 16 MiB + headroom


def _mish_kernel(x_ref, o_ref):
    x = x_ref[...].astype(jnp.float32)
    # tanh(softplus(x)) = t*(t+2) / (t*(t+2) + 2), t = exp(x).
    # Clamp the exp argument so t*(t+2) stays finite in f32; for x > 20 the
    # factor rounds to exactly 1.0 in f32, so y = x there (matches true mish).
    t = jnp.exp(jnp.minimum(x, 20.0))
    num = t * (t + 2.0)
    y = x * num / (num + 2.0)           # exact divide: HBM-bound, so it's free
    o_ref[...] = y.astype(o_ref.dtype)


def _mish_exact_jnp(x):
    """Exact Mish in plain jnp, used only for the <128-element ragged tail."""
    x32 = x.astype(jnp.float32)
    sp = jnp.maximum(x32, 0.0) + jnp.log1p(jnp.exp(-jnp.abs(x32)))
    return (x32 * jnp.tanh(sp)).astype(x.dtype)


def _mish_slab(x2d: jax.Array) -> jax.Array:
    """Run the Pallas kernel over a (rows, 128) lane-dense slab."""
    rows, _ = x2d.shape
    dtype = x2d.dtype
    itemsize = jnp.dtype(dtype).itemsize
    # Native sublane tiling: 8 rows for 32-bit, 16 for 16-bit, 32 for 8-bit.
    sublane = max(8, 32 // itemsize)

    if rows <= 4 * sublane:
        # Truly tiny input: one block (full-array block shape is always legal).
        block_rows = rows
        grid = (1,)
    else:
        # Target ~4 MiB blocks, but never fewer than _MIN_PIPELINE_STEPS steps
        # so the DMA pipeline has something to overlap and v7x's second
        # TensorCore gets work along the "parallel" axis.
        block_rows = max(
            sublane,
            (_TARGET_BLOCK_BYTES // (_LANE * itemsize)) // sublane * sublane,
        )
        step_cap = max(
            sublane,
            (pl.cdiv(rows, _MIN_PIPELINE_STEPS) // sublane) * sublane,
        )
        block_rows = min(block_rows, step_cap)
        grid = (pl.cdiv(rows, block_rows),)   # ragged last block is masked

    n_elems = rows * _LANE
    cost = pl.CostEstimate(
        flops=6 * n_elems,
        transcendentals=2 * n_elems,
        bytes_accessed=2 * n_elems * itemsize,
    )

    return pl.pallas_call(
        _mish_kernel,
        out_shape=jax.ShapeDtypeStruct((rows, _LANE), dtype),
        grid_spec=pltpu.PrefetchScalarGridSpec(
            num_scalar_prefetch=0,
            grid=grid,
            in_specs=[pl.BlockSpec((block_rows, _LANE), lambda i: (i, 0))],
            out_specs=pl.BlockSpec((block_rows, _LANE), lambda i: (i, 0)),
        ),
        compiler_params=pltpu.CompilerParams(
            dimension_semantics=("parallel",),
            vmem_limit_bytes=_VMEM_LIMIT_BYTES,
        ),
        cost_estimate=cost,
    )(x2d)


def mish(x: jax.Array) -> jax.Array:
    """Mish activation implemented as a Pallas TPU kernel. Accepts any shape."""
    orig_shape = x.shape
    n = x.size
    if n == 0:
        return x

    x_flat = jnp.ravel(x)                 # free bitcast-reshape for contiguous x
    n_main = (n // _LANE) * _LANE

    if n_main == n:
        # Lane-aligned (common NCHW conv-activation case): no pad, no slice.
        y2d = _mish_slab(x_flat.reshape(n // _LANE, _LANE))
        return y2d.reshape(orig_shape)

    if n_main == 0:
        # Sub-lane-sized tensor: not worth a kernel launch; exact formula.
        return _mish_exact_jnp(x_flat).reshape(orig_shape)

    # Unaligned: kernel over the 128-aligned prefix, exact jnp for the <128
    # element tail, then stitch.  Avoids the old full-array pad and full-array
    # output slice (each a full extra HBM pass).
    # TODO(synk): a fully zero-extra-pass ragged path would need 1D/manual-DMA
    # handling of the tail inside the kernel; not worth it for a <128 remainder.
    x_main = x_flat[:n_main].reshape(n_main // _LANE, _LANE)
    y_main = _mish_slab(x_main).reshape(-1)
    y_tail = _mish_exact_jnp(x_flat[n_main:])
    return jnp.concatenate([y_main, y_tail]).reshape(orig_shape)


def _mish_ref(x):
    x32 = x.astype(jnp.float32)
    sp = jnp.maximum(x32, 0.0) + jnp.log1p(jnp.exp(-jnp.abs(x32)))
    return (x32 * jnp.tanh(sp)).astype(x.dtype)


if __name__ == "__main__":
    key = jax.random.PRNGKey(0)

    # Primary test: NCHW, matching PyTorch conv-style inputs (aligned,
    # single-block tiny path).
    x = jax.random.normal(key, (2, 4, 16, 16), dtype=jnp.float32) * 3.0
    y = mish(x)
    jax.block_until_ready(y)
    y_ref = _mish_ref(x)
    assert y.shape == x.shape and y.dtype == x.dtype
    assert jnp.allclose(y, y_ref, atol=1e-5, rtol=1e-4), "mismatch (aligned path)"

    # Unaligned element count: exercises the aligned-prefix + exact-tail path.
    x_odd = jax.random.normal(jax.random.PRNGKey(1), (2, 3, 5, 7), dtype=jnp.float32) * 3.0
    y_odd = mish(x_odd)
    jax.block_until_ready(y_odd)
    assert jnp.allclose(y_odd, _mish_ref(x_odd), atol=1e-5, rtol=1e-4), "mismatch (ragged path)"

    # Moderate input: exercises the multi-block (grid >= 4) pipelined path.
    x_big = jax.random.normal(jax.random.PRNGKey(2), (2, 16, 64, 64), dtype=jnp.float32) * 3.0
    y_big = mish(x_big)
    jax.block_until_ready(y_big)
    assert jnp.allclose(y_big, _mish_ref(x_big), atol=1e-5, rtol=1e-4), "mismatch (multi-block path)"

    print("KERNEL_OK")
</pallas_src>

<mosaic_0001>
module attributes {stable_mosaic.version = 11 : i64} {
  func.func @_mish_kernel(%arg0: i32, %arg1: memref<16x128xf32, #tpu.memory_space<vmem>>, %arg2: memref<16x128xf32, #tpu.memory_space<vmem>>) attributes {dimension_semantics = [#tpu.dimension_semantics<parallel>], iteration_bounds = array<i64: 1>, scalar_prefetch = 0 : i64, scratch_operands = 0 : i64, tpu.core_type = #tpu.core_type<tc>, window_params = [{transform_indices = @transform_0, window_bounds = array<i64: 16, 128>}, {transform_indices = @transform_1, window_bounds = array<i64: 16, 128>}]} {
    %c0 = arith.constant 0 : index
    %c0_0 = arith.constant 0 : index
    %0 = vector.load %arg1[%c0, %c0_0] : memref<16x128xf32, #tpu.memory_space<vmem>>, vector<16x128xf32>
    %cst = arith.constant 2.000000e+01 : f32
    %1 = vector.broadcast %cst : f32 to vector<16x128xf32>
    %2 = arith.minimumf %0, %1 : vector<16x128xf32>
    %3 = math.exp %2 : vector<16x128xf32>
    %cst_1 = arith.constant 2.000000e+00 : f32
    %4 = vector.broadcast %cst_1 : f32 to vector<16x128xf32>
    %5 = arith.addf %3, %4 : vector<16x128xf32>
    %6 = arith.mulf %3, %5 : vector<16x128xf32>
    %7 = arith.mulf %0, %6 : vector<16x128xf32>
    %cst_2 = arith.constant 2.000000e+00 : f32
    %8 = vector.broadcast %cst_2 : f32 to vector<16x128xf32>
    %9 = arith.addf %6, %8 : vector<16x128xf32>
    %10 = arith.divf %7, %9 : vector<16x128xf32>
    %c0_3 = arith.constant 0 : index
    %c0_4 = arith.constant 0 : index
    %11 = vector.load %arg2[%c0_3, %c0_4] : memref<16x128xf32, #tpu.memory_space<vmem>>, vector<16x128xf32>
    tpu.vector_store %arg2[%c0_3, %c0_4], %10 {strides = array<i32>} : memref<16x128xf32, #tpu.memory_space<vmem>>, vector<16x128xf32>,
    return
  }
  func.func @transform_0(%arg0: i32) -> (i32, i32) {
    %c0_i32 = arith.constant 0 : i32
    %c0_i32_0 = arith.constant 0 : i32
    return %arg0, %c0_i32 : i32, i32
  }
  func.func @transform_1(%arg0: i32) -> (i32, i32) {
    %c0_i32 = arith.constant 0 : i32
    %c0_i32_0 = arith.constant 0 : i32
    return %arg0, %c0_i32 : i32, i32
  }
}

</mosaic_0001>

<bundles_post_ra>
// kernel: tpu_custom_call.1
= control target key start
LH: loop header
LB: loop body
LE: loop exit
PB: predicated region body
PF: predicated region fallthrough
CT: control target
= control target key end

     0   :  { %6 = vsyncpa [#allocation3], 0  ;;  %s188_s0 = inlined_call_operand.hbm [shape: f32[16,128], index: 0, kind: input, shape index: {}]   ;;  %s189_s1 = inlined_call_operand.hbm [shape: f32[16,128], index: 1, kind: output, shape index: {}]  }
   0x1   :  { %7 = vsyncpa [#allocation4], 0  ;;  %s12_s8 = sshll.u32 %s188_s0, 4  ;;  %s156_s9 = smov [#allocation2]   ;;  %s13_s8 = int_to_ptr.hbm [resolvable:$true] %s12_s8 }
   0x2   :  { %s14_s10 = sshll.u32 %s156_s9, 4  ;;  %s157_s11 = smov 128   ;;  %s15_s10 = int_to_ptr.vmem [resolvable:$true] %s14_s10 }
   0x3   :  { %s158_s12 = smov 8  }
   0x4   :  { %20 = dma.hbm_to_vmem [thread:$0]  %s13_s8, 256, %s15_s10, [#allocation3], %s157_s11, %s157_s11, %s158_s12  }
   0x5   :  { %152 = dma.done.wait [#allocation3], 256  }
   0x6   :  { %153 = vsyncadd [#allocation3], 4294967040  ;;  %v25_v0 = vld [vmem:[#allocation2] sm:$0xff]  ;;  %v26_v1 = vld [vmem:[#allocation2 + $0x8] sm:$0xff]  ;;  %s159_s0 = smov [#allocation5]   ;;  %s79_s16 = sshll.u32 %s189_s1, 4  ;;  %s80_s16 = int_to_ptr.hbm [resolvable:$true] %s79_s16 }
   0x7   :  { %v27_v2 = vmin.f32 %v25_v0, 20.0  ;;  %v28_v3 = vmin.f32 %v26_v1, 20.0  ;;  %s77_s13 = sshll.u32 %s159_s0, 4  ;;  %s78_s13 = int_to_ptr.vmem [resolvable:$true] %s77_s13 }
   0x9   :  { %v29_v4 = vmul.f32 1.442695, %v27_v2  ;;  %v31_v5 = vmul.f32 1.442695, %v28_v3 }
   0xb   :  { %96 = vpow2.f32 %v29_v4 }
   0xc   :  { %98 = vpow2.f32 %v31_v5 }
  0x11   :  { %v97_v6 = vpop.eup %96 }
  0x12   :  { %v99_v7 = vpop.eup %98  ;;  %v33_v8 = vadd.f32 2.0, %v97_v6 }
  0x13   :  { %v34_v9 = vadd.f32 2.0, %v99_v7 }
  0x14   :  { %v35_v10 = vmul.f32 %v97_v6, %v33_v8 }
  0x15   :  { %v36_v11 = vmul.f32 %v99_v7, %v34_v9 }
  0x16   :  { %v39_v12 = vadd.f32 2.0, %v35_v10  ;;  %v37_v28 = vmul.f32 %v35_v10, %v25_v0 }
  0x17   :  { %v40_v13 = vadd.f32 2.0, %v36_v11  ;;  %v38_v31 = vmul.f32 %v36_v11, %v26_v1 }
  0x18   :  { %100 = vrcp.f32 %v39_v12  ;;  %vm46_vm0 = vweird.f32 %v39_v12  ;;  %v52_v17 = vand.u32 2147483648, %v39_v12  ;;  %v50_v20 = vand.u32 2147483647, %v39_v12 }
  0x19   :  { %102 = vrcp.f32 %v40_v13  ;;  %v67_v21 = vand.u32 2147483648, %v40_v13  ;;  %vm61_vm2 = vweird.f32 %v40_v13  ;;  %v65_v23 = vand.u32 2147483647, %v40_v13 }
  0x1a   :  { %v53_v26 = vor.u32 1.1754944e-38, %v52_v17  ;;  %vm51_vm5 = vcmp.eq.f32.partialorder %v50_v20, 8.507059e+37 }
  0x1b   :  { %v68_v30 = vor.u32 1.1754944e-38, %v67_v21  ;;  %vm66_vm7 = vcmp.eq.f32.partialorder %v65_v23, 8.507059e+37 }
  0x1e   :  { %v101_v14 = vpop.eup %100 }
  0x1f   :  { %v103_v15 = vpop.eup %102  ;;  %v42_v16 = vmul.f32 %v101_v14, %v39_v12  ;;  %vm47_vm1 = vweird.f32 %v101_v14 }
  0x20   :  { %v57_v18 = vmul.f32 %v103_v15, %v40_v13  ;;  %vm62_vm3 = vweird.f32 %v103_v15  ;;  %vm176_vm4 = vmor %vm46_vm0, %vm47_vm1 }
  0x21   :  { %v43_v19 = vsub.f32 1.0, %v42_v16  ;;  %vm63_vm6 = vmor %vm61_vm2, %vm62_vm3 }
  0x22   :  { %v58_v22 = vsub.f32 1.0, %v57_v18 }
  0x23   :  { %v44_v24 = vmul.f32 %v101_v14, %v43_v19 }
  0x24   :  { %v59_v27 = vmul.f32 %v103_v15, %v58_v22 }
  0x25   :  { %v45_v29 = vadd.f32 %v101_v14, %v44_v24 }
  0x26   :  { %v60_v32 = vadd.f32 %v103_v15, %v59_v27 }
  0x27   :  { %v49_v33 = vsel %vm176_vm4, %v101_v14, %v45_v29 }
  0x28   :  { %v54_v34 = vsel %vm51_vm5, %v53_v26, %v49_v33  ;;  %v64_v35 = vsel %vm63_vm6, %v103_v15, %v60_v32 }
  0x29   :  { %v55_v36 = vmul.f32 %v54_v34, %v37_v28  ;;  %v69_v37 = vsel %vm66_vm7, %v68_v30, %v64_v35 }
  0x2a   :  { %v70_v38 = vmul.f32 %v69_v37, %v38_v31 }
  0x2b   :  { %71 = vst [vmem:[#allocation5] sm:$0xff] %v55_v36 }
  0x2c   :  { %72 = vst [vmem:[#allocation5 + $0x8] sm:$0xff] %v70_v38 }
  0x2d   :  { %85 = dma.vmem_to_hbm [thread:$0]  %s78_s13, 256, %s80_s16, [#allocation4], %s157_s11, %s157_s11, %s158_s12  }
  0x2e   :  { %154 = dma.done.wait [#allocation4], 256  }
  0x2f   :  { %155 = vsyncadd [#allocation4], 4294967040 }
  0x30   :  { %90 = vsyncpa [#allocation3], 1 }
  0x31   :  { %91 = vsyncpa [#allocation4], 1 }

</bundles_post_ra>
